<compile_context>
chip_gen: v7x
topology: tpu7x:2x2x1
jax: 0.10.0
libtpu: 0.0.40
codegen_flags: <defaults>
</compile_context>

<pallas_src>
import jax
import jax.numpy as jnp
from jax.experimental import pallas as pl
from jax.experimental.pallas import tpu as pltpu


# ---------------------------------------------------------------------------
# Kernels
# ---------------------------------------------------------------------------

def _mlp_kernel_single_k(x_ref, w_ref, b_ref, o_ref):
    """Whole K fits in one block: single MXU matmul + bias + tanh, no scratch."""
    acc = jnp.dot(x_ref[...], w_ref[...], preferred_element_type=jnp.float32)
    y = acc + b_ref[...].astype(jnp.float32)          # (1, tn) broadcast
    o_ref[...] = jnp.tanh(y).astype(o_ref.dtype)       # tanh -> EUP


def _mlp_kernel_multi_k(x_ref, w_ref, b_ref, o_ref, acc_ref):
    """One (tm, tn) output tile; grid axis 2 walks the K reduction."""
    k = pl.program_id(2)

    @pl.when(k == 0)
    def _():
        acc_ref[...] = jnp.zeros_like(acc_ref)

    acc_ref[...] += jnp.dot(
        x_ref[...], w_ref[...], preferred_element_type=jnp.float32
    )

    @pl.when(k == pl.num_programs(2) - 1)
    def _():
        y = acc_ref[...] + b_ref[...].astype(jnp.float32)
        o_ref[...] = jnp.tanh(y).astype(o_ref.dtype)


# ---------------------------------------------------------------------------
# Tiling helpers
# ---------------------------------------------------------------------------

def _round_up(x, m):
    return ((x + m - 1) // m) * m


def _pick_tile(dim, target, base):
    """Largest tile <= target that is a multiple of `base` and divides `dim`.
    Falls back to the full extent (block == array dim is always legal)."""
    if dim <= target:
        return dim
    cap = (min(target, dim) // base) * base
    t = cap
    while t >= base:
        if dim % t == 0:
            return t
        t -= base
    return dim


def _plan_m(m, target, base=8):
    """Return (padded_m, tile_m): tile is a multiple of `base`, divides the
    padded extent, and is capped by `target` (pads rather than falling back
    to a full-extent block so VMEM stays bounded for any batch size)."""
    padded = _round_up(m, base)
    if padded <= target:
        return padded, padded
    cap = (target // base) * base
    t = cap
    while t >= base:
        if padded % t == 0 and t * 4 >= cap:   # avoid degenerate tiny tiles
            return padded, t
        t -= base
    return _round_up(padded, cap), cap


# ---------------------------------------------------------------------------
# pallas_call wrapper
# ---------------------------------------------------------------------------

def mlp_forward(features, w_t, bias, *,
                tm_target=256, tn_target=512, tk_target=512):
    """tanh(features @ w_t + bias); features [..., H_in], w_t [H_in, H_out]."""
    orig_shape = features.shape
    h_in = orig_shape[-1]
    h_out = w_t.shape[1]
    x = features.reshape(-1, h_in)
    M, K = x.shape
    N = h_out
    b2d = bias.reshape(1, N)

    # Row (batch*seq) axis: pad to an 8-aligned tile so blocks are always
    # (8,128)-friendly and bounded regardless of the leading shape.
    Mp, tm = _plan_m(M, tm_target)
    if Mp != M:
        x = jnp.pad(x, ((0, Mp - M), (0, 0)))

    # Hidden dims are typically multiples of 128; full-extent fallback covers
    # the small / irregular cases (block == array dim is always legal).
    tn = _pick_tile(N, tn_target, 128)   # lane-dense output tiles
    tk = _pick_tile(K, tk_target, 128)

    grid_m, grid_n, grid_k = Mp // tm, N // tn, K // tk

    if grid_k == 1:
        out = pl.pallas_call(
            _mlp_kernel_single_k,
            out_shape=jax.ShapeDtypeStruct((Mp, N), features.dtype),
            grid=(grid_m, grid_n),
            in_specs=[
                pl.BlockSpec((tm, K), lambda i, j: (i, 0)),    # activations
                pl.BlockSpec((K, tn), lambda i, j: (0, j)),    # weight (pre-T)
                pl.BlockSpec((1, tn), lambda i, j: (0, j)),    # bias
            ],
            out_specs=pl.BlockSpec((tm, tn), lambda i, j: (i, j)),
            compiler_params=pltpu.CompilerParams(
                dimension_semantics=("parallel", "parallel")),
        )(x, w_t, b2d)
    else:
        out = pl.pallas_call(
            _mlp_kernel_multi_k,
            out_shape=jax.ShapeDtypeStruct((Mp, N), features.dtype),
            grid=(grid_m, grid_n, grid_k),
            in_specs=[
                pl.BlockSpec((tm, tk), lambda i, j, k: (i, k)),   # activations
                pl.BlockSpec((tk, tn), lambda i, j, k: (k, j)),   # weight
                pl.BlockSpec((1, tn), lambda i, j, k: (0, j)),    # bias
            ],
            out_specs=pl.BlockSpec((tm, tn), lambda i, j, k: (i, j)),
            scratch_shapes=[pltpu.VMEM((tm, tn), jnp.float32)],
            compiler_params=pltpu.CompilerParams(
                dimension_semantics=("parallel", "parallel", "arbitrary")),
        )(x, w_t, b2d)

    if Mp != M:
        out = out[:M]
    return out.reshape(*orig_shape[:-1], N)


# ---------------------------------------------------------------------------
# Module-equivalent wrapper
# ---------------------------------------------------------------------------

class MLPLayer:
    """JAX/Pallas port of the PyTorch MLPLayer: dense(H, H) followed by Tanh."""

    def __init__(self, hidden_size, key, dtype=jnp.float32):
        kw, kb = jax.random.split(key)
        bound = 1.0 / (hidden_size ** 0.5)
        # Stored already transposed: [H_in, H_out] (== PyTorch weight.T).
        self.w_t = jax.random.uniform(
            kw, (hidden_size, hidden_size), dtype=dtype,
            minval=-bound, maxval=bound)
        self.bias = jax.random.uniform(
            kb, (hidden_size,), dtype=dtype, minval=-bound, maxval=bound)

    def __call__(self, features):
        return mlp_forward(features, self.w_t, self.bias)


# ---------------------------------------------------------------------------
# Pure-JAX reference
# ---------------------------------------------------------------------------

def _ref_mlp(features, w_t, bias):
    return jnp.tanh(features @ w_t + bias)


# ---------------------------------------------------------------------------
# Main
# ---------------------------------------------------------------------------

if __name__ == "__main__":
    B, S, H = 2, 8, 32
    key = jax.random.PRNGKey(0)
    k_layer, k_cls, k_seq = jax.random.split(key, 3)

    layer = MLPLayer(H, k_layer)

    # CLS-style pooled sentence representations: [B, H].
    cls_feats = jax.random.normal(k_cls, (B, H), dtype=jnp.float32)
    # Also exercise a [B, S, H] input (Linear applies over the last dim).
    seq_feats = jax.random.normal(k_seq, (B, S, H), dtype=jnp.float32)

    out_cls = jax.block_until_ready(layer(cls_feats))
    out_seq = jax.block_until_ready(layer(seq_feats))

    ref_cls = _ref_mlp(cls_feats, layer.w_t, layer.bias)
    ref_seq = _ref_mlp(seq_feats, layer.w_t, layer.bias)

    assert out_cls.shape == (B, H), out_cls.shape
    assert out_seq.shape == (B, S, H), out_seq.shape
    assert jnp.allclose(out_cls, ref_cls, atol=1e-5, rtol=1e-5)
    assert jnp.allclose(out_seq, ref_seq, atol=1e-5, rtol=1e-5)

    print("KERNEL_OK")
</pallas_src>

<mosaic_0001>
module attributes {stable_mosaic.version = 11 : i64} {
  func.func @_mlp_kernel_single_k(%arg0: i32, %arg1: i32, %arg2: memref<8x32xf32, #tpu.memory_space<vmem>>, %arg3: memref<32x32xf32, #tpu.memory_space<vmem>>, %arg4: memref<1x32xf32, #tpu.memory_space<vmem>>, %arg5: memref<8x32xf32, #tpu.memory_space<vmem>>) attributes {dimension_semantics = [#tpu.dimension_semantics<parallel>, #tpu.dimension_semantics<parallel>], iteration_bounds = array<i64: 1, 1>, scalar_prefetch = 0 : i64, scratch_operands = 0 : i64, tpu.core_type = #tpu.core_type<tc>, window_params = [{transform_indices = @transform_0, window_bounds = array<i64: 8, 32>}, {transform_indices = @transform_1, window_bounds = array<i64: 32, 32>}, {transform_indices = @transform_2, window_bounds = array<i64: 1, 32>}, {transform_indices = @transform_3, window_bounds = array<i64: 8, 32>}]} {
    %c0 = arith.constant 0 : index
    %c0_0 = arith.constant 0 : index
    %0 = vector.load %arg2[%c0, %c0_0] : memref<8x32xf32, #tpu.memory_space<vmem>>, vector<8x32xf32>
    %c0_1 = arith.constant 0 : index
    %c0_2 = arith.constant 0 : index
    %1 = vector.load %arg3[%c0_1, %c0_2] : memref<32x32xf32, #tpu.memory_space<vmem>>, vector<32x32xf32>
    %cst = arith.constant dense<0.000000e+00> : vector<8x32xf32>
    %2 = tpu.matmul %0, %1, %cst {dimension_numbers = #tpu.dot_dimension_numbers<[1], [0], [0], [1], [0, 0, 1, 1], [], []>} : vector<8x32xf32>, vector<32x32xf32>, vector<8x32xf32> -> vector<8x32xf32>
    %c0_3 = arith.constant 0 : index
    %c0_4 = arith.constant 0 : index
    %3 = vector.load %arg4[%c0_3, %c0_4] : memref<1x32xf32, #tpu.memory_space<vmem>>, vector<1x32xf32>
    %4 = vector.broadcast %3 : vector<1x32xf32> to vector<8x32xf32>
    %5 = arith.addf %2, %4 : vector<8x32xf32>
    %6 = math.tanh %5 : vector<8x32xf32>
    %c0_5 = arith.constant 0 : index
    %c0_6 = arith.constant 0 : index
    %7 = vector.load %arg5[%c0_5, %c0_6] : memref<8x32xf32, #tpu.memory_space<vmem>>, vector<8x32xf32>
    tpu.vector_store %arg5[%c0_5, %c0_6], %6 {strides = array<i32>} : memref<8x32xf32, #tpu.memory_space<vmem>>, vector<8x32xf32>,
    return
  }
  func.func @transform_0(%arg0: i32, %arg1: i32) -> (i32, i32) {
    %c0_i32 = arith.constant 0 : i32
    %c0_i32_0 = arith.constant 0 : i32
    return %arg0, %c0_i32 : i32, i32
  }
  func.func @transform_1(%arg0: i32, %arg1: i32) -> (i32, i32) {
    %c0_i32 = arith.constant 0 : i32
    %c0_i32_0 = arith.constant 0 : i32
    return %c0_i32, %arg1 : i32, i32
  }
  func.func @transform_2(%arg0: i32, %arg1: i32) -> (i32, i32) {
    %c0_i32 = arith.constant 0 : i32
    %c0_i32_0 = arith.constant 0 : i32
    return %c0_i32, %arg1 : i32, i32
  }
  func.func @transform_3(%arg0: i32, %arg1: i32) -> (i32, i32) {
    %c0_i32 = arith.constant 0 : i32
    return %arg0, %arg1 : i32, i32
  }
}

</mosaic_0001>

<bundles_post_ra>
// kernel: tpu_custom_call.1
= control target key start
LH: loop header
LB: loop body
LE: loop exit
PB: predicated region body
PF: predicated region fallthrough
CT: control target
= control target key end

     0   :  { %8 = vsyncpa [#allocation3], 0  ;;  %s325_s0 = inlined_call_operand.hbm [shape: f32[8,32], index: 0, kind: input, shape index: {}]   ;;  %s326_s1 = inlined_call_operand.hbm [shape: f32[32,32], index: 1, kind: input, shape index: {}]   ;;  %s327_s2 = inlined_call_operand.vmem [shape: f32[1,32], index: 2, kind: input, shape index: {}]   ;;  %s328_s3 = inlined_call_operand.hbm [shape: f32[8,32], index: 3, kind: output, shape index: {}]  }
   0x1   :  { %9 = vsyncpa [#allocation6], 0 }
   0x2   :  { %10 = vsyncpa [#allocation4], 0  ;;  %s251_s12 = smov [#allocation2]   ;;  %s252_s14 = smov [#allocation5]  }
   0x3   :  { %s17_s13 = sshll.u32 %s251_s12, 4  ;;  %s26_s15 = sshll.u32 %s252_s14, 4  ;;  %s18_s13 = int_to_ptr.vmem [resolvable:$true] %s17_s13  ;;  %s279_s15 = int_to_ptr.vmem [resolvable:$true] %s26_s15 }
   0x4   :  { %s179_s18 = scalar_lea.hbm %s325_s0, 128 }
   0x5   :  { %p180_p0 = scmp.ne.s32.totalorder %s325_s0, %s179_s18  ;;  %p183_p1 = scmp.lt.u32.totalorder %s179_s18, %s325_s0 }
   0x7   :  { %p185_p2 = pnand %p183_p1, %p180_p0 }
   0x9   :  { %188 = shalt.err (!%p185_p2)
}
   0xa   :  { %s189_s23 = scalar_lea.vmem %s18_s13, 128  ;;  %p194_p4 = scmp.lt.s32.totalorder %s18_s13, %s18_s13 }
   0xb   :  { %p190_p3 = scmp.ne.s32.totalorder %s18_s13, %s189_s23  ;;  %p195_p5 = scmp.lt.s32.totalorder %s189_s23, %s189_s23 }
   0xd   :  { %p196_p6 = por %p195_p5, %p194_p4 }
   0xf   :  { %p197_p7 = pnand %p196_p6, %p190_p3 }
  0x11   :  { %200 = shalt.err (!%p197_p7)
}
  0x12   :  { %20 = dma.hbm_to_vmem [thread:$0]  %s325_s0, 128, %s18_s13, [#allocation3]  }
  0x13   :  { %s201_s28 = scalar_lea.hbm %s326_s1, 512 }
  0x14   :  { %p202_p8 = scmp.ne.s32.totalorder %s326_s1, %s201_s28  ;;  %p205_p9 = scmp.lt.u32.totalorder %s201_s28, %s326_s1 }
  0x16   :  { %p207_p10 = pnand %p205_p9, %p202_p8 }
  0x18   :  { %210 = shalt.err (!%p207_p10)
}
  0x19   :  { %s211_s6 = scalar_lea.vmem %s279_s15, 512  ;;  %p216_p12 = scmp.lt.s32.totalorder %s279_s15, %s279_s15 }
  0x1a   :  { %p212_p11 = scmp.ne.s32.totalorder %s279_s15, %s211_s6  ;;  %p217_p13 = scmp.lt.s32.totalorder %s211_s6, %s211_s6 }
  0x1c   :  { %p218_p0 = por %p217_p13, %p216_p12 }
  0x1e   :  { %p219_p1 = pnand %p218_p0, %p212_p11 }
  0x20   :  { %222 = shalt.err (!%p219_p1)
}
  0x21   :  { %s253_s0 = smov 128   ;;  %s254_s7 = smov 8  }
  0x22   :  { %32 = dma.hbm_to_vmem [thread:$0]  %s326_s1, 512, %s279_s15, [#allocation6], %s253_s0, %s253_s0, %s254_s7  }
  0x23   :  { %245 = dma.done.wait [#allocation3], 128  }
  0x24   :  { %246 = vsyncadd [#allocation3], 4294967168 }
  0x25   :  { %247 = dma.done.wait [#allocation6], 512  }
  0x26   :  { %248 = vsyncadd [#allocation6], 4294966784  ;;  %v255_v0 = vmov 0.0|0.0   ;;  %vm256_vm0 = vmmov 0   ;;  %v257_v1 = vmov 0.0   ;;  %v42_v2 = vld [vmem:[#allocation5] sm:$0xff] }
  0x27   :  { %163 = vmatprep.subr.bf16.mxu0 %v255_v0  ;;  %160 = vmatprep.mubr.msk.f32.mxu0 %vm256_vm0, %v257_v1  ;;  %v43_v3 = vld [vmem:[#allocation5 + $0x8] sm:$0xff]  ;;  %v44_v4 = vld [vmem:[#allocation5 + $0x10] sm:$0xff]  ;;  %v45_v6 = vld [vmem:[#allocation5 + $0x18] sm:$0xff]  ;;  %vm53_vm1 = vcmask 261120   ;;  %s258_s11 = smov [#allocation7]  }
  0x28   :  { %v164_v5 = vpack.c.bf16 %v43_v3, %v42_v2  ;;  %v167_v7 = vpack.c.bf16 %v45_v6, %v44_v4  ;;  %v41_v8 = vld [vmem:[#allocation2] sm:$0xff]  ;;  %s135_s12 = sshll.u32 %s258_s11, 4  ;;  %s136_s12 = int_to_ptr.vmem [resolvable:$true] %s135_s12 }
  0x29   :  { %v145_v9 = vld [vmem:[%s327_s2] ss:$0 sm:$0xff]  ;;  %s223_s13 = scalar_lea.vmem %s136_s12, 128  ;;  %p228_p3 = scmp.lt.s32.totalorder %s136_s12, %s136_s12 }
  0x2a   :  { %165 = vmatpush3.bf16.msra.mxu0 %v164_v5  ;;  %p224_p2 = scmp.ne.s32.totalorder %s136_s12, %s223_s13  ;;  %p229_p4 = scmp.lt.s32.totalorder %s223_s13, %s223_s13 }
  0x2b   :  { %166 = vmatprep.subr.bf16.mxu0 %v255_v0 }
  0x2c   :  { %p230_p5 = por %p229_p4, %p228_p3 }
  0x2e   :  { %168 = vmatpush3.bf16.msra.mxu0 %v167_v7  ;;  %p231_p6 = pnand %p230_p5, %p224_p2 }
  0x31   :  { %161 = vmatmul.mubr.msk.f32.vlgmr.msra.gmra.mrb[0].mxu0 %vm53_vm1, %v41_v8 }
 0x104   :  { %v123_v10 = vpop.f32.mrb[0].mxu0 }
 0x105   :  { %v124_v11 = vadd.f32 %v145_v9, %v123_v10  ;;  %v162_v12 = vpop.f32.mrb[1].mxu0 }
 0x107   :  { %177 = vtanh.f32 %v124_v11 }
 0x111   :  { %v178_v13 = vpop.eup %177 }
 0x112   :  { %128 = vst.msk [vmem:[#allocation7] sm:$0xff] %vm53_vm1, %v178_v13 }
 0x113   :  { %234 = shalt.err (!%p231_p6)
}
 0x114   :  { %s235_s2 = scalar_lea.hbm %s328_s3, 128 }
 0x115   :  { %p236_p7 = scmp.ne.s32.totalorder %s328_s3, %s235_s2  ;;  %p239_p8 = scmp.lt.u32.totalorder %s235_s2, %s328_s3 }
 0x117   :  { %p241_p9 = pnand %p239_p8, %p236_p7 }
 0x119   :  { %244 = shalt.err (!%p241_p9)
}
 0x11a   :  { %138 = dma.vmem_to_hbm [thread:$0]  %s136_s12, 128, %s328_s3, [#allocation4]  }
 0x11b   :  { %249 = dma.done.wait [#allocation4], 128  }
 0x11c   :  { %250 = vsyncadd [#allocation4], 4294967168 }
 0x11d   :  { %142 = vsyncpa [#allocation3], 1 }
 0x11e   :  { %143 = vsyncpa [#allocation6], 1 }
 0x11f   :  { %144 = vsyncpa [#allocation4], 1 }

</bundles_post_ra>
